<compile_context>
chip_gen: v6e
topology: v6e:2x2x1
jax: 0.10.0
libtpu: 0.0.40
codegen_flags: <defaults>
</compile_context>

<pallas_src>
import jax
import jax.numpy as jnp
import numpy as np
from jax.experimental import pallas as pl
from jax.experimental.pallas import tpu as pltpu


def _round_up(x, m):
    return ((x + m - 1) // m) * m


def _make_kernel(widths, num_cross):
    """Build the kernel, closed over the static feature widths and #cross layers."""
    n_pieces = len(widths)
    offsets = []
    off = 0
    for w in widths:
        offsets.append(off)
        off += w

    def kernel(*refs):
        piece_refs = refs[:n_pieces]
        (cw_ref, cb_ref, w1_ref, b1_ref, w2_ref, b2_ref,
         wfc_ref, wfd_ref, bf_ref, out_ref, x0_scr) = refs[n_pieces:]

        # --- Assemble x0 tile directly in VMEM (pieces stream in as bf16; the concatenated
        #     feature matrix is never written to / re-read from HBM). ---
        for p_ref, o, w in zip(piece_refs, offsets, widths):
            x0_scr[:, o:o + w] = p_ref[...].astype(jnp.float32)
        x0 = x0_scr[...]                                        # (bm, D) f32

        # --- Cross network: xl = x0 * (xl @ w + b) + xl, in f32.
        #     Weights hoisted out of the (small, statically unrolled) loop;
        #     the mat-vec is a VPU multiply + cross-lane reduce (no MXU). ---
        cw = cw_ref[...]                                        # (L, D)
        cb = cb_ref[...]                                        # (L, D)
        xl = x0
        for l in range(num_cross):
            w_row = cw[l:l + 1, :]                              # (1, D)
            b_row = cb[l:l + 1, :]                              # (1, D)
            s = jnp.sum(xl * w_row, axis=-1, keepdims=True)     # (bm, 1) == xl @ w
            xl = x0 * (s + b_row) + xl                          # (bm,1)+(1,D) -> (bm,D), as in torch

        # --- Deep MLP: bf16 MXU matmuls with f32 accumulation. ---
        h = jnp.dot(x0.astype(jnp.bfloat16), w1_ref[...],
                    preferred_element_type=jnp.float32) + b1_ref[...]
        h = jnp.maximum(h, 0.0)
        h = jnp.dot(h.astype(jnp.bfloat16), w2_ref[...],
                    preferred_element_type=jnp.float32) + b2_ref[...]
        h = jnp.maximum(h, 0.0)

        # --- Final linear on concat([cross, deep]) as two VPU-mul + lane-reduce ops
        #     (avoids N=1 MXU matmuls), then sigmoid with the divide on the EUP. ---
        logit = (jnp.sum(xl * wfc_ref[...], axis=-1, keepdims=True)
                 + jnp.sum(h * wfd_ref[...], axis=-1, keepdims=True)
                 + bf_ref[...])                                 # (bm, 1)
        sig = pl.reciprocal(1.0 + jnp.exp(-logit), approx=False)
        out_ref[...] = sig.astype(out_ref.dtype)

    return kernel


def _choose_bm(B, widths, D, h1, h2, budget_bytes=24 << 20):
    """Largest batch tile (multiple of 16) whose working set fits a conservative VMEM budget
    (safe on v7x's 64 MiB), without over-padding small batches; keeps >=2 grid steps for
    large batches so both v7x TensorCores get work."""
    lane = 128
    cap = _round_up(max(B, 16), 16)
    limit = _round_up(max(16, cap // 2), 16) if B >= 512 else cap
    for cand in (2048, 1024, 512, 256, 128, 64, 32, 16):
        bm = min(cand, limit)
        need = (sum(2 * bm * max(w, lane) * 2 for w in widths)          # dbl-buffered bf16 tiles
                + bm * max(D, lane) * 4                                  # f32 x0 scratch
                + bm * 4 * (2 * max(D, lane) + max(h1, lane) + max(h2, lane) + lane))
        if need <= budget_bytes:
            return bm
    return 16


def _vmem_limit_bytes(bm, widths, D, h1, h2, weights):
    lane = 128
    piece_bytes = sum(2 * bm * max(w, lane) * 2 for w in widths)
    weight_bytes = 2 * sum(int(np.prod(a.shape)) * a.dtype.itemsize for a in weights)
    scratch_bytes = bm * max(D, lane) * 4
    live_bytes = bm * 4 * (2 * max(D, lane) + max(h1, lane) + max(h2, lane) + lane)
    out_bytes = 2 * bm * lane * 4
    est = piece_bytes + weight_bytes + scratch_bytes + live_bytes + out_bytes + (4 << 20)
    return int(min(max(est, 32 << 20), 64 << 20))


def dcnv2_forward(params, sparse_input, dense_input, *, bm=None, interpret=False):
    # Glue: embedding lookups (left to XLA), streamed in bf16. Order matches
    # torch.cat([dense_input, torch.cat(embedding_list, -1)], -1).
    pieces = [dense_input.astype(jnp.bfloat16)]
    for name in sparse_input:
        pieces.append(jnp.take(params["emb"][name], sparse_input[name],
                               axis=0).astype(jnp.bfloat16))
    widths = tuple(int(p.shape[-1]) for p in pieces)
    D = int(sum(widths))
    B = int(pieces[0].shape[0])
    h1 = int(params["w1"].shape[1])
    h2 = int(params["w2"].shape[1])
    L = int(params["cross_w"].shape[0])

    if bm is None:
        bm = _choose_bm(B, widths, D, h1, h2)
    bm = max(16, (bm // 16) * 16)
    B_pad = _round_up(B, bm)
    if B_pad != B:
        pad = B_pad - B
        pieces = [jnp.pad(p, ((0, pad), (0, 0))) for p in pieces]

    # Weights: cross math stays f32; MXU matmul weights in bf16; final linear as row vectors.
    cw = params["cross_w"].astype(jnp.float32)                    # (L, D)
    cb = params["cross_b"].astype(jnp.float32)                    # (L, D)
    w1 = params["w1"].astype(jnp.bfloat16)                        # (D, h1)
    w2 = params["w2"].astype(jnp.bfloat16)                        # (h1, h2)
    b1 = params["b1"].astype(jnp.float32).reshape(1, h1)
    b2 = params["b2"].astype(jnp.float32).reshape(1, h2)
    wfc = params["wf_cross"].astype(jnp.float32).reshape(1, D)
    wfd = params["wf_deep"].astype(jnp.float32).reshape(1, h2)
    bf = params["bf"].astype(jnp.float32).reshape(1, 1)
    weights = (cw, cb, w1, b1, w2, b2, wfc, wfd, bf)

    def piece_spec(w):
        return pl.BlockSpec((bm, w), lambda i: (i, 0))

    def full_spec(a):
        nd = a.ndim
        return pl.BlockSpec(a.shape, lambda i, _nd=nd: (0,) * _nd)

    kernel = _make_kernel(widths, L)
    grid = (B_pad // bm,)

    out = pl.pallas_call(
        kernel,
        out_shape=jax.ShapeDtypeStruct((B_pad, 1), jnp.float32),
        grid=grid,
        in_specs=[piece_spec(w) for w in widths] + [full_spec(a) for a in weights],
        out_specs=pl.BlockSpec((bm, 1), lambda i: (i, 0)),
        scratch_shapes=[pltpu.VMEM((bm, D), jnp.float32)],
        compiler_params=pltpu.CompilerParams(
            dimension_semantics=("parallel",),
            vmem_limit_bytes=_vmem_limit_bytes(bm, widths, D, h1, h2, weights)),
        interpret=interpret,
    )(*pieces, *weights)
    return out[:B]


def dcnv2_reference(params, sparse_input, dense_input):
    """Pure-JAX reference mirroring the PyTorch forward (with the same bf16 streaming /
    f32 accumulation numerics as the kernel)."""
    pieces = [dense_input.astype(jnp.bfloat16)]
    for name in sparse_input:
        pieces.append(jnp.take(params["emb"][name], sparse_input[name],
                               axis=0).astype(jnp.bfloat16))
    x0 = jnp.concatenate(pieces, axis=-1).astype(jnp.float32)
    # cross network (f32)
    xl = x0
    L = params["cross_w"].shape[0]
    for l in range(L):
        w = params["cross_w"][l:l + 1, :]
        b = params["cross_b"][l:l + 1, :]
        s = jnp.sum(xl * w, axis=-1, keepdims=True)               # == xl @ w (D,1)
        xl = x0 * (s + b) + xl
    # deep network (bf16 operands, f32 accumulation)
    w1 = params["w1"].astype(jnp.bfloat16)
    w2 = params["w2"].astype(jnp.bfloat16)
    h = jnp.maximum(jnp.dot(x0.astype(jnp.bfloat16), w1,
                            preferred_element_type=jnp.float32)
                    + params["b1"].reshape(1, -1), 0.0)
    h = jnp.maximum(jnp.dot(h.astype(jnp.bfloat16), w2,
                            preferred_element_type=jnp.float32)
                    + params["b2"].reshape(1, -1), 0.0)
    logit = (jnp.sum(xl * params["wf_cross"].reshape(1, -1), axis=-1, keepdims=True)
             + jnp.sum(h * params["wf_deep"].reshape(1, -1), axis=-1, keepdims=True)
             + params["bf"].reshape(1, 1))
    return 1.0 / (1.0 + jnp.exp(-logit))


def init_params(key, sparse_feature_info, num_dense_features,
                cross_layers=3, deep_hidden_dims=(128, 64)):
    D = num_dense_features + sum(ed for _, (_, ed) in sparse_feature_info.items())
    keys = jax.random.split(key, 8 + len(sparse_feature_info))
    ki = iter(keys)
    params = {"emb": {}}
    for name, (vocab, edim) in sparse_feature_info.items():
        params["emb"][name] = jax.random.normal(next(ki), (vocab, edim), jnp.float32)
    # Cross layers: torch.randn(D,1) weight, zeros(D) bias
    params["cross_w"] = jax.random.normal(next(ki), (cross_layers, D), jnp.float32)
    params["cross_b"] = jnp.zeros((cross_layers, D), jnp.float32)
    # Deep network
    h1, h2 = deep_hidden_dims
    params["w1"] = jax.random.normal(next(ki), (D, h1), jnp.float32) * 0.1
    params["b1"] = jax.random.normal(next(ki), (1, h1), jnp.float32) * 0.1
    params["w2"] = jax.random.normal(next(ki), (h1, h2), jnp.float32) * 0.1
    params["b2"] = jax.random.normal(next(ki), (1, h2), jnp.float32) * 0.1
    # Final linear on (D + h2) -> 1, split into the two concat halves
    params["wf_cross"] = jax.random.normal(next(ki), (D, 1), jnp.float32) * 0.1
    params["wf_deep"] = jax.random.normal(next(ki), (h2, 1), jnp.float32) * 0.1
    params["bf"] = jnp.zeros((1, 1), jnp.float32)
    return params, D


if __name__ == "__main__":
    key = jax.random.PRNGKey(0)

    # Small synthetic configuration
    sparse_feature_info = {"cat_a": (16, 4), "cat_b": (32, 8)}   # name -> (vocab, embed_dim)
    num_dense_features = 4
    batch = 16

    k_params, k_dense, k_a, k_b = jax.random.split(key, 4)
    params, D = init_params(k_params, sparse_feature_info, num_dense_features)

    dense_input = jax.random.normal(k_dense, (batch, num_dense_features), jnp.float32)
    sparse_input = {
        "cat_a": jax.random.randint(k_a, (batch,), 0, sparse_feature_info["cat_a"][0]),
        "cat_b": jax.random.randint(k_b, (batch,), 0, sparse_feature_info["cat_b"][0]),
    }

    out = dcnv2_forward(params, sparse_input, dense_input)
    out = jax.block_until_ready(out)

    ref = dcnv2_reference(params, sparse_input, dense_input)
    np.testing.assert_allclose(np.asarray(out), np.asarray(ref), rtol=1e-5, atol=1e-5)

    print("KERNEL_OK")
</pallas_src>

<mosaic_0001>
module attributes {stable_mosaic.version = 11 : i64} {
  func.func @kernel(%arg0: i32, %arg1: memref<16x4xbf16, #tpu.memory_space<vmem>>, %arg2: memref<16x4xbf16, #tpu.memory_space<vmem>>, %arg3: memref<16x8xbf16, #tpu.memory_space<vmem>>, %arg4: memref<3x16xf32, #tpu.memory_space<vmem>>, %arg5: memref<3x16xf32, #tpu.memory_space<vmem>>, %arg6: memref<16x128xbf16, #tpu.memory_space<vmem>>, %arg7: memref<1x128xf32, #tpu.memory_space<vmem>>, %arg8: memref<128x64xbf16, #tpu.memory_space<vmem>>, %arg9: memref<1x64xf32, #tpu.memory_space<vmem>>, %arg10: memref<1x16xf32, #tpu.memory_space<vmem>>, %arg11: memref<1x64xf32, #tpu.memory_space<vmem>>, %arg12: memref<1x1xf32, #tpu.memory_space<vmem>>, %arg13: memref<16x1xf32, #tpu.memory_space<vmem>>, %arg14: memref<16x16xf32, #tpu.memory_space<vmem>>) attributes {dimension_semantics = [#tpu.dimension_semantics<parallel>], iteration_bounds = array<i64: 1>, scalar_prefetch = 0 : i64, scratch_operands = 1 : i64, tpu.core_type = #tpu.core_type<tc>, window_params = [{transform_indices = @transform_0, window_bounds = array<i64: 16, 4>}, {transform_indices = @transform_1, window_bounds = array<i64: 16, 4>}, {transform_indices = @transform_2, window_bounds = array<i64: 16, 8>}, {pipeline_mode = #tpu.pipeline_mode<synchronous>, transform_indices = @transform_3, window_bounds = array<i64: 3, 16>}, {pipeline_mode = #tpu.pipeline_mode<synchronous>, transform_indices = @transform_4, window_bounds = array<i64: 3, 16>}, {pipeline_mode = #tpu.pipeline_mode<synchronous>, transform_indices = @transform_5, window_bounds = array<i64: 16, 128>}, {pipeline_mode = #tpu.pipeline_mode<synchronous>, transform_indices = @transform_6, window_bounds = array<i64: 1, 128>}, {pipeline_mode = #tpu.pipeline_mode<synchronous>, transform_indices = @transform_7, window_bounds = array<i64: 128, 64>}, {pipeline_mode = #tpu.pipeline_mode<synchronous>, transform_indices = @transform_8, window_bounds = array<i64: 1, 64>}, {pipeline_mode = #tpu.pipeline_mode<synchronous>, transform_indices = @transform_9, window_bounds = array<i64: 1, 16>}, {pipeline_mode = #tpu.pipeline_mode<synchronous>, transform_indices = @transform_10, window_bounds = array<i64: 1, 64>}, {pipeline_mode = #tpu.pipeline_mode<synchronous>, transform_indices = @transform_11, window_bounds = array<i64: 1, 1>}, {transform_indices = @transform_12, window_bounds = array<i64: 16, 1>}]} {
    %c0 = arith.constant 0 : index
    %c0_0 = arith.constant 0 : index
    %0 = vector.load %arg1[%c0, %c0_0] : memref<16x4xbf16, #tpu.memory_space<vmem>>, vector<16x4xbf16>
    %1 = arith.extf %0 : vector<16x4xbf16> to vector<16x4xf32>
    %c0_1 = arith.constant 0 : index
    %c0_2 = arith.constant 0 : index
    %2 = vector.load %arg14[%c0_1, %c0_2] : memref<16x16xf32, #tpu.memory_space<vmem>>, vector<16x4xf32>
    tpu.vector_store %arg14[%c0_1, %c0_2], %1 {strides = array<i32>} : memref<16x16xf32, #tpu.memory_space<vmem>>, vector<16x4xf32>,
    %c0_3 = arith.constant 0 : index
    %c0_4 = arith.constant 0 : index
    %3 = vector.load %arg2[%c0_3, %c0_4] : memref<16x4xbf16, #tpu.memory_space<vmem>>, vector<16x4xbf16>
    %4 = arith.extf %3 : vector<16x4xbf16> to vector<16x4xf32>
    %c0_5 = arith.constant 0 : index
    %c4 = arith.constant 4 : index
    %5 = vector.load %arg14[%c0_5, %c4] : memref<16x16xf32, #tpu.memory_space<vmem>>, vector<16x4xf32>
    tpu.vector_store %arg14[%c0_5, %c4], %4 {strides = array<i32>} : memref<16x16xf32, #tpu.memory_space<vmem>>, vector<16x4xf32>,
    %c0_6 = arith.constant 0 : index
    %c0_7 = arith.constant 0 : index
    %6 = vector.load %arg3[%c0_6, %c0_7] : memref<16x8xbf16, #tpu.memory_space<vmem>>, vector<16x8xbf16>
    %7 = arith.extf %6 : vector<16x8xbf16> to vector<16x8xf32>
    %c0_8 = arith.constant 0 : index
    %c8 = arith.constant 8 : index
    %8 = vector.load %arg14[%c0_8, %c8] : memref<16x16xf32, #tpu.memory_space<vmem>>, vector<16x8xf32>
    tpu.vector_store %arg14[%c0_8, %c8], %7 {strides = array<i32>} : memref<16x16xf32, #tpu.memory_space<vmem>>, vector<16x8xf32>,
    %c0_9 = arith.constant 0 : index
    %c0_10 = arith.constant 0 : index
    %9 = vector.load %arg14[%c0_9, %c0_10] : memref<16x16xf32, #tpu.memory_space<vmem>>, vector<16x16xf32>
    %c0_11 = arith.constant 0 : index
    %c0_12 = arith.constant 0 : index
    %10 = vector.load %arg4[%c0_11, %c0_12] : memref<3x16xf32, #tpu.memory_space<vmem>>, vector<3x16xf32>
    %c0_13 = arith.constant 0 : index
    %c0_14 = arith.constant 0 : index
    %11 = vector.load %arg5[%c0_13, %c0_14] : memref<3x16xf32, #tpu.memory_space<vmem>>, vector<3x16xf32>
    %12 = vector.extract_strided_slice %10 {offsets = [0, 0], sizes = [1, 16], strides = [1, 1]} : vector<3x16xf32> to vector<1x16xf32>
    %13 = vector.extract_strided_slice %11 {offsets = [0, 0], sizes = [1, 16], strides = [1, 1]} : vector<3x16xf32> to vector<1x16xf32>
    %14 = vector.broadcast %12 : vector<1x16xf32> to vector<16x16xf32>
    %15 = arith.mulf %9, %14 : vector<16x16xf32>
    %cst = arith.constant dense<0.000000e+00> : vector<16xf32>
    %16 = vector.multi_reduction <add>, %15, %cst [1] : vector<16x16xf32> to vector<16xf32>
    %17 = vector.shape_cast %16 : vector<16xf32> to vector<16x1xf32>
    %18 = vector.broadcast %17 : vector<16x1xf32> to vector<16x16xf32>
    %19 = vector.broadcast %13 : vector<1x16xf32> to vector<16x16xf32>
    %20 = arith.addf %18, %19 : vector<16x16xf32>
    %21 = arith.mulf %9, %20 : vector<16x16xf32>
    %22 = arith.addf %21, %9 : vector<16x16xf32>
    %23 = vector.extract_strided_slice %10 {offsets = [1, 0], sizes = [1, 16], strides = [1, 1]} : vector<3x16xf32> to vector<1x16xf32>
    %24 = vector.extract_strided_slice %11 {offsets = [1, 0], sizes = [1, 16], strides = [1, 1]} : vector<3x16xf32> to vector<1x16xf32>
    %25 = vector.broadcast %23 : vector<1x16xf32> to vector<16x16xf32>
    %26 = arith.mulf %22, %25 : vector<16x16xf32>
    %cst_15 = arith.constant dense<0.000000e+00> : vector<16xf32>
    %27 = vector.multi_reduction <add>, %26, %cst_15 [1] : vector<16x16xf32> to vector<16xf32>
    %28 = vector.shape_cast %27 : vector<16xf32> to vector<16x1xf32>
    %29 = vector.broadcast %28 : vector<16x1xf32> to vector<16x16xf32>
    %30 = vector.broadcast %24 : vector<1x16xf32> to vector<16x16xf32>
    %31 = arith.addf %29, %30 : vector<16x16xf32>
    %32 = arith.mulf %9, %31 : vector<16x16xf32>
    %33 = arith.addf %32, %22 : vector<16x16xf32>
    %34 = vector.extract_strided_slice %10 {offsets = [2, 0], sizes = [1, 16], strides = [1, 1]} : vector<3x16xf32> to vector<1x16xf32>
    %35 = vector.extract_strided_slice %11 {offsets = [2, 0], sizes = [1, 16], strides = [1, 1]} : vector<3x16xf32> to vector<1x16xf32>
    %36 = vector.broadcast %34 : vector<1x16xf32> to vector<16x16xf32>
    %37 = arith.mulf %33, %36 : vector<16x16xf32>
    %cst_16 = arith.constant dense<0.000000e+00> : vector<16xf32>
    %38 = vector.multi_reduction <add>, %37, %cst_16 [1] : vector<16x16xf32> to vector<16xf32>
    %39 = vector.shape_cast %38 : vector<16xf32> to vector<16x1xf32>
    %40 = vector.broadcast %39 : vector<16x1xf32> to vector<16x16xf32>
    %41 = vector.broadcast %35 : vector<1x16xf32> to vector<16x16xf32>
    %42 = arith.addf %40, %41 : vector<16x16xf32>
    %43 = arith.mulf %9, %42 : vector<16x16xf32>
    %44 = arith.addf %43, %33 : vector<16x16xf32>
    %45 = arith.truncf %9 : vector<16x16xf32> to vector<16x16xbf16>
    %c0_17 = arith.constant 0 : index
    %c0_18 = arith.constant 0 : index
    %46 = vector.load %arg6[%c0_17, %c0_18] : memref<16x128xbf16, #tpu.memory_space<vmem>>, vector<16x128xbf16>
    %cst_19 = arith.constant dense<0.000000e+00> : vector<16x128xf32>
    %47 = tpu.matmul %45, %46, %cst_19 {dimension_numbers = #tpu.dot_dimension_numbers<[1], [0], [0], [1], [0, 0, 1, 1], [], []>} : vector<16x16xbf16>, vector<16x128xbf16>, vector<16x128xf32> -> vector<16x128xf32>
    %c0_20 = arith.constant 0 : index
    %c0_21 = arith.constant 0 : index
    %48 = vector.load %arg7[%c0_20, %c0_21] : memref<1x128xf32, #tpu.memory_space<vmem>>, vector<1x128xf32>
    %49 = vector.broadcast %48 : vector<1x128xf32> to vector<16x128xf32>
    %50 = arith.addf %47, %49 : vector<16x128xf32>
    %cst_22 = arith.constant 0.000000e+00 : f32
    %51 = vector.broadcast %cst_22 : f32 to vector<16x128xf32>
    %52 = arith.maximumf %50, %51 : vector<16x128xf32>
    %53 = arith.truncf %52 : vector<16x128xf32> to vector<16x128xbf16>
    %c0_23 = arith.constant 0 : index
    %c0_24 = arith.constant 0 : index
    %54 = vector.load %arg8[%c0_23, %c0_24] : memref<128x64xbf16, #tpu.memory_space<vmem>>, vector<128x64xbf16>
    %cst_25 = arith.constant dense<0.000000e+00> : vector<16x64xf32>
    %55 = tpu.matmul %53, %54, %cst_25 {dimension_numbers = #tpu.dot_dimension_numbers<[1], [0], [0], [1], [0, 0, 1, 1], [], []>} : vector<16x128xbf16>, vector<128x64xbf16>, vector<16x64xf32> -> vector<16x64xf32>
    %c0_26 = arith.constant 0 : index
    %c0_27 = arith.constant 0 : index
    %56 = vector.load %arg9[%c0_26, %c0_27] : memref<1x64xf32, #tpu.memory_space<vmem>>, vector<1x64xf32>
    %57 = vector.broadcast %56 : vector<1x64xf32> to vector<16x64xf32>
    %58 = arith.addf %55, %57 : vector<16x64xf32>
    %cst_28 = arith.constant 0.000000e+00 : f32
    %59 = vector.broadcast %cst_28 : f32 to vector<16x64xf32>
    %60 = arith.maximumf %58, %59 : vector<16x64xf32>
    %c0_29 = arith.constant 0 : index
    %c0_30 = arith.constant 0 : index
    %61 = vector.load %arg10[%c0_29, %c0_30] : memref<1x16xf32, #tpu.memory_space<vmem>>, vector<1x16xf32>
    %62 = vector.broadcast %61 : vector<1x16xf32> to vector<16x16xf32>
    %63 = arith.mulf %44, %62 : vector<16x16xf32>
    %cst_31 = arith.constant dense<0.000000e+00> : vector<16xf32>
    %64 = vector.multi_reduction <add>, %63, %cst_31 [1] : vector<16x16xf32> to vector<16xf32>
    %65 = vector.shape_cast %64 : vector<16xf32> to vector<16x1xf32>
    %c0_32 = arith.constant 0 : index
    %c0_33 = arith.constant 0 : index
    %66 = vector.load %arg11[%c0_32, %c0_33] : memref<1x64xf32, #tpu.memory_space<vmem>>, vector<1x64xf32>
    %67 = vector.broadcast %66 : vector<1x64xf32> to vector<16x64xf32>
    %68 = arith.mulf %60, %67 : vector<16x64xf32>
    %cst_34 = arith.constant dense<0.000000e+00> : vector<16xf32>
    %69 = vector.multi_reduction <add>, %68, %cst_34 [1] : vector<16x64xf32> to vector<16xf32>
    %70 = vector.shape_cast %69 : vector<16xf32> to vector<16x1xf32>
    %71 = arith.addf %65, %70 : vector<16x1xf32>
    %c0_35 = arith.constant 0 : index
    %c0_36 = arith.constant 0 : index
    %72 = vector.load %arg12[%c0_35, %c0_36] : memref<1x1xf32, #tpu.memory_space<vmem>>, vector<1x1xf32>
    %73 = vector.broadcast %72 : vector<1x1xf32> to vector<16x1xf32>
    %74 = arith.addf %71, %73 : vector<16x1xf32>
    %cst_37 = arith.constant 0.000000e+00 : f32
    %75 = vector.broadcast %cst_37 : f32 to vector<16x1xf32>
    %76 = arith.subf %75, %74 : vector<16x1xf32>
    %77 = math.exp %76 : vector<16x1xf32>
    %cst_38 = arith.constant 1.000000e+00 : f32
    %78 = vector.broadcast %cst_38 : f32 to vector<16x1xf32>
    %79 = arith.addf %78, %77 : vector<16x1xf32>
    %80 = tpu.reciprocal %79 : vector<16x1xf32> -> vector<16x1xf32>
    %c0_39 = arith.constant 0 : index
    %c0_40 = arith.constant 0 : index
    %81 = vector.load %arg13[%c0_39, %c0_40] : memref<16x1xf32, #tpu.memory_space<vmem>>, vector<16x1xf32>
    tpu.vector_store %arg13[%c0_39, %c0_40], %80 {strides = array<i32>} : memref<16x1xf32, #tpu.memory_space<vmem>>, vector<16x1xf32>,
    return
  }
  func.func @transform_0(%arg0: i32) -> (i32, i32) {
    %c0_i32 = arith.constant 0 : i32
    %c0_i32_0 = arith.constant 0 : i32
    return %arg0, %c0_i32 : i32, i32
  }
  func.func @transform_1(%arg0: i32) -> (i32, i32) {
    %c0_i32 = arith.constant 0 : i32
    %c0_i32_0 = arith.constant 0 : i32
    return %arg0, %c0_i32 : i32, i32
  }
  func.func @transform_2(%arg0: i32) -> (i32, i32) {
    %c0_i32 = arith.constant 0 : i32
    %c0_i32_0 = arith.constant 0 : i32
    return %arg0, %c0_i32 : i32, i32
  }
  func.func @transform_3(%arg0: i32) -> (i32, i32) {
    %c0_i32 = arith.constant 0 : i32
    %c0_i32_0 = arith.constant 0 : i32
    %c0_i32_1 = arith.constant 0 : i32
    return %c0_i32, %c0_i32_0 : i32, i32
  }
  func.func @transform_4(%arg0: i32) -> (i32, i32) {
    %c0_i32 = arith.constant 0 : i32
    %c0_i32_0 = arith.constant 0 : i32
    %c0_i32_1 = arith.constant 0 : i32
    return %c0_i32, %c0_i32_0 : i32, i32
  }
  func.func @transform_5(%arg0: i32) -> (i32, i32) {
    %c0_i32 = arith.constant 0 : i32
    %c0_i32_0 = arith.constant 0 : i32
    %c0_i32_1 = arith.constant 0 : i32
    return %c0_i32, %c0_i32_0 : i32, i32
  }
  func.func @transform_6(%arg0: i32) -> (i32, i32) {
    %c0_i32 = arith.constant 0 : i32
    %c0_i32_0 = arith.constant 0 : i32
    %c0_i32_1 = arith.constant 0 : i32
    return %c0_i32, %c0_i32_0 : i32, i32
  }
  func.func @transform_7(%arg0: i32) -> (i32, i32) {
    %c0_i32 = arith.constant 0 : i32
    %c0_i32_0 = arith.constant 0 : i32
    %c0_i32_1 = arith.constant 0 : i32
    return %c0_i32, %c0_i32_0 : i32, i32
  }
  func.func @transform_8(%arg0: i32) -> (i32, i32) {
    %c0_i32 = arith.constant 0 : i32
    %c0_i32_0 = arith.constant 0 : i32
    %c0_i32_1 = arith.constant 0 : i32
    return %c0_i32, %c0_i32_0 : i32, i32
  }
  func.func @transform_9(%arg0: i32) -> (i32, i32) {
    %c0_i32 = arith.constant 0 : i32
    %c0_i32_0 = arith.constant 0 : i32
    %c0_i32_1 = arith.constant 0 : i32
    return %c0_i32, %c0_i32_0 : i32, i32
  }
  func.func @transform_10(%arg0: i32) -> (i32, i32) {
    %c0_i32 = arith.constant 0 : i32
    %c0_i32_0 = arith.constant 0 : i32
    %c0_i32_1 = arith.constant 0 : i32
    return %c0_i32, %c0_i32_0 : i32, i32
  }
  func.func @transform_11(%arg0: i32) -> (i32, i32) {
    %c0_i32 = arith.constant 0 : i32
    %c0_i32_0 = arith.constant 0 : i32
    %c0_i32_1 = arith.constant 0 : i32
    return %c0_i32, %c0_i32_0 : i32, i32
  }
  func.func @transform_12(%arg0: i32) -> (i32, i32) {
    %c0_i32 = arith.constant 0 : i32
    %c0_i32_0 = arith.constant 0 : i32
    return %arg0, %c0_i32 : i32, i32
  }
}

</mosaic_0001>

<bundles_post_ra>
// kernel: tpu_custom_call.1
= control target key start
LH: loop header
LB: loop body
LE: loop exit
PB: predicated region body
PF: predicated region fallthrough
CT: control target
= control target key end

     0   :  { %vm48_vm0 = vcmask 31744   ;;  %v483_v3 = vmov 0.0   ;;  %vm484_vm1 = vmmov 0   ;;  %v85_v13 = vlaneseq  ;;  %s670_s1 = inlined_call_operand.vmem [shape: bf16[16,4], index: 1, kind: input, shape index: {}]   ;;  %s671_s2 = inlined_call_operand.vmem [shape: bf16[16,8], index: 2, kind: input, shape index: {}]   ;;  %s672_s0 = inlined_call_operand.vmem [shape: bf16[16,4], index: 0, kind: input, shape index: {}]   ;;  %s673_s5 = inlined_call_operand.vmem [shape: bf16[16,128], index: 5, kind: input, shape index: {}]   ;;  %s674_s3 = inlined_call_operand.vmem [shape: f32[3,16], index: 3, kind: input, shape index: {}]   ;;  %s675_s7 = inlined_call_operand.vmem [shape: bf16[128,64], index: 7, kind: input, shape index: {}]   ;;  %s676_s4 = inlined_call_operand.vmem [shape: f32[3,16], index: 4, kind: input, shape index: {}]   ;;  %s677_s6 = inlined_call_operand.vmem [shape: f32[1,128], index: 6, kind: input, shape index: {}]   ;;  %s678_s8 = inlined_call_operand.vmem [shape: f32[1,64], index: 8, kind: input, shape index: {}]   ;;  %s679_s10 = inlined_call_operand.vmem [shape: f32[1,64], index: 10, kind: input, shape index: {}]   ;;  %s680_s11 = inlined_call_operand.<no memory space> [shape: f32[1,1], index: 11, kind: input, shape index: {}]   ;;  %s681_s9 = inlined_call_operand.vmem [shape: f32[1,16], index: 9, kind: input, shape index: {}]   ;;  %s682_s12 = inlined_call_operand.vmem [shape: f32[16,1], index: 12, kind: output, shape index: {}]  }
   0x1   :  { %v408_v0 = vld [vmem:[%s670_s1] sm:$0xff]   ;;  %426 = vmatprep.subr.bf16.mxu0 %v483_v3  ;;  %432 = vmatprep.subr.bf16.mxu1 %v483_v3  ;;  %vm63_vm2 = vcmask 64544   ;;  %vm78_vm3 = vcmask 130112   ;;  %vm91_vm4 = vcmask 130048   ;;  %v467_v31 = vld [vmem:[%s675_s7 + $0x38] sm:$0xff]   ;;  %v468_v32 = vld [vmem:[%s675_s7 + $0x30] sm:$0xff]  }
   0x2   :  { %v412_v1 = vld [vmem:[%s671_s2] sm:$0xff]   ;;  %v409_v4 = vunpack.c.l.bf16 %v408_v0  ;;  %v410_v5 = vunpack.c.h.bf16 %v408_v0  ;;  %428 = vmatprep.mubr.msk.bf16.mxu0 %vm484_vm1, %v483_v3  ;;  %448 = vmatprep.mubr.msk.bf16.mxu1 %vm484_vm1, %v483_v3  ;;  %s486_s2 = smov 8   ;;  %v570_v17 = vshrl.u32 %v85_v13, 7  ;;  %v469_v33 = vld [vmem:[%s675_s7 + $0x28] sm:$0xff]   ;;  %v471_v35 = vld [vmem:[%s675_s7 + $0x18] sm:$0xff]   ;;  %vm353_vm5 = vcmask 523264  }
   0x3   :  { %v404_v2 = vld [vmem:[%s672_s0] sm:$0xff]   ;;  %v413_v6 = vunpack.c.l.bf16 %v412_v1  ;;  %v414_v7 = vunpack.c.h.bf16 %v412_v1  ;;  %s485_s0 = smov 4   ;;  %433 = vmatpush3.bf16.msra.mxu1 %v467_v31  ;;  %v472_v36 = vld [vmem:[%s675_s7 + $0x10] sm:$0xff]   ;;  %v473_v37 = vld [vmem:[%s675_s7 + $0x8] sm:$0xff]   ;;  %vm381_vm6 = vcmask 7168  }
   0x4   :  { %v466_v8 = vld [vmem:[%s673_s5] sm:$0xff]   ;;  %v405_v9 = vunpack.c.l.bf16 %v404_v2  ;;  %v406_v10 = vunpack.c.h.bf16 %v404_v2  ;;  %v456_v11 = vpack.i.bf16 %v410_v5, %v409_v4  ;;  %v87_v21 = vsub.s32 0, %v570_v17  ;;  %434 = vmatprep.subr.bf16.mxu1 %v483_v3 }
   0x5   :  { %427 = vmatpush3.bf16.msra.mxu0 %v466_v8  ;;  %v461_v12 = vpack.i.bf16 %v414_v7, %v413_v6  ;;  %v576_v22 = vld [vmem:[%s674_s3] sm:$0x7]  ;;  %v110_v41 = vsub.s32 1, %v570_v17  ;;  %v132_v2 = vsub.s32 2, %v570_v17 }
   0x6   :  { %49 = vst.msk [vmem:[#allocation2] sm:$0xff] %vm48_vm0, %v405_v9  ;;  %50 = vst.msk [vmem:[#allocation2 + $0x8] sm:$0xff] %vm48_vm0, %v406_v10  ;;  %457 = vrot.lane.b32.xlu0 %v456_v11, %s485_s0  ;;  %v88_v23 = vrot.slane %v576_v22, %v87_v21  ;;  %v470_v34 = vld [vmem:[%s675_s7 + $0x20] sm:$0xff]  }
   0x7   :  { %435 = vmatpush3.bf16.msra.mxu1 %v468_v32  ;;  %v474_v38 = vld [vmem:[%s675_s7] sm:$0xff]   ;;  %v111_v45 = vrot.slane %v576_v22, %v110_v41  ;;  %v133_v6 = vrot.slane %v576_v22, %v132_v2 }
   0x8   :  { %436 = vmatprep.subr.bf16.mxu1 %v483_v3  ;;  %v624_v39 = vld [vmem:[%s676_s4] sm:$0x7] }
   0x9   :  { %v101_v40 = vrot.slane %v624_v39, %v87_v21  ;;  %v388_v55 = vld [vmem:[%s677_s6] ss:$0 sm:$0xff]  ;;  %v123_v1 = vrot.slane %v624_v39, %v110_v41 }
   0xa   :  { %462 = vrot.lane.b32.xlu0 %v461_v12, %s486_s2 }
   0xb   :  { %437 = vmatpush3.bf16.msra.mxu1 %v469_v33 }
   0xc   :  { %438 = vmatprep.subr.bf16.mxu1 %v483_v3 }
   0xf   :  { %439 = vmatpush3.bf16.msra.mxu1 %v470_v34  ;;  %v400_v34 = vld [vmem:[%s681_s9] ss:$0 sm:$0xff] }
  0x10   :  { %440 = vmatprep.subr.bf16.mxu1 %v483_v3 }
  0x13   :  { %441 = vmatpush3.bf16.msra.mxu1 %v471_v35 }
  0x14   :  { %442 = vmatprep.subr.bf16.mxu1 %v483_v3 }
  0x17   :  { %443 = vmatpush3.bf16.msra.mxu1 %v472_v36 }
  0x18   :  { %444 = vmatprep.subr.bf16.mxu1 %v483_v3 }
  0x1b   :  { %445 = vmatpush3.bf16.msra.mxu1 %v473_v37 }
  0x1c   :  { %446 = vmatprep.subr.bf16.mxu1 %v483_v3 }
  0x1f   :  { %447 = vmatpush3.bf16.msra.mxu1 %v474_v38 }
  0x78   :  { %v458_v14 = vpop.permute.xlu0 %457 }
  0x79   :  { %v460_v15 = vunpack.i.h.bf16 %v458_v14  ;;  %v459_v16 = vunpack.i.l.bf16 %v458_v14 }
  0x7b   :  { %64 = vst.msk [vmem:[#allocation2] sm:$0xff] %vm63_vm2, %v459_v16  ;;  %65 = vst.msk [vmem:[#allocation2 + $0x8] sm:$0xff] %vm63_vm2, %v460_v15  ;;  %v391_v16 = vld [vmem:[%s678_s8] ss:$0 sm:$0xff] }
  0x7c   :  { %v463_v18 = vpop.permute.xlu0 %462 }
  0x7d   :  { %v465_v19 = vunpack.i.h.bf16 %v463_v18  ;;  %v464_v20 = vunpack.i.l.bf16 %v463_v18 }
  0x7f   :  { %79 = vst.msk [vmem:[#allocation2] sm:$0xff] %vm78_vm3, %v464_v20  ;;  %80 = vst.msk [vmem:[#allocation2 + $0x8] sm:$0xff] %vm78_vm3, %v465_v19  ;;  %v401_v20 = vld [vmem:[%s679_s10] ss:$0 sm:$0xff] }
  0x86   :  { %v579_v24 = vld [vmem:[#allocation2] sm:$0xff]  ;;  %v581_v25 = vld [vmem:[#allocation2 + $0x8] sm:$0xff] }
  0x87   :  { %v152_v26 = vpack.c.bf16 %v581_v25, %v579_v24  ;;  %v89_v27 = vmul.f32 %v88_v23, %v579_v24  ;;  %v90_v29 = vmul.f32 %v88_v23, %v581_v25 }
  0x89   :  { %429 = vmatmul.mubr.msk.bf16.vlgmr.msra.gmra.mxu0 %vm91_vm4, %v152_v26  ;;  %v92_v28 = vsel %vm91_vm4, %v89_v27, 0.0  ;;  %v95_v30 = vsel %vm91_vm4, %v90_v29, 0.0  ;;  %v145_v29 = vrot.slane %v624_v39, %v132_v2 }
  0x8a   :  { %93 = vadd.xlane.f32.xlu1 %v92_v28  ;;  %v17_v28 = vstv %s680_s11 }
  0x8b   :  { %18 = vst [vmem:[#allocation3] sm:$0x1] %v17_v28 }
  0x8e   :  { %96 = vadd.xlane.f32.xlu1 %v95_v30 }
 0x113   :  { %v94_v42 = vpop.xlane.xlu1 %93 }
 0x114   :  { %v102_v43 = vadd.f32 %v101_v40, %v94_v42 }
 0x116   :  { %v104_v44 = vmul.f32 %v102_v43, %v579_v24 }
 0x117   :  { %v97_v46 = vpop.xlane.xlu1 %96 }
 0x118   :  { %v103_v47 = vadd.f32 %v101_v40, %v97_v46  ;;  %v106_v48 = vadd.f32 %v104_v44, %v579_v24 }
 0x11a   :  { %v105_v49 = vmul.f32 %v103_v47, %v581_v25  ;;  %v112_v50 = vmul.f32 %v111_v45, %v106_v48  ;;  %v402_v47 = vld [vmem:[#allocation3] ss:$0 sm:$0xff] }
 0x11c   :  { %v114_v51 = vsel %vm91_vm4, %v112_v50, 0.0  ;;  %v107_v52 = vadd.f32 %v105_v49, %v581_v25 }
 0x11d   :  { %115 = vadd.xlane.f32.xlu0 %v114_v51 }
 0x11e   :  { %v113_v53 = vmul.f32 %v111_v45, %v107_v52 }
 0x120   :  { %v117_v54 = vsel %vm91_vm4, %v113_v53, 0.0 }
 0x121   :  { %118 = vadd.xlane.f32.xlu1 %v117_v54 }
 0x149   :  { %v205_v56 = vpop.f32.mrf.mxu0 }
 0x14a   :  { %v206_v58 = vadd.f32 %v388_v55, %v205_v56 }
 0x14b   :  { %v430_v57 = vpop.f32.mrf.mxu0 }
 0x14c   :  { %v212_v62 = vmax.f32 %v206_v58, 0.0 }
 0x14d   :  { %v208_v59 = vpop.f32.mrf.mxu0 }
 0x14e   :  { %v209_v60 = vadd.f32 %v388_v55, %v208_v59 }
 0x14f   :  { %v431_v61 = vpop.f32.mrf.mxu0 }
 0x150   :  { %v213_v63 = vmax.f32 %v209_v60, 0.0 }
 0x152   :  { %v214_v0 = vpack.c.bf16 %v213_v63, %v212_v62 }
 0x154   :  { %449 = vmatmul.mubr.bf16.vlgmr.msra.gmra.mxu1 %v214_v0 }
 0x1a6   :  { %v116_v3 = vpop.xlane.xlu0 %115 }
 0x1a7   :  { %v124_v4 = vadd.f32 %v123_v1, %v116_v3 }
 0x1a9   :  { %v126_v5 = vmul.f32 %v124_v4, %v579_v24 }
 0x1aa   :  { %v119_v7 = vpop.xlane.xlu1 %118 }
 0x1ab   :  { %v125_v8 = vadd.f32 %v123_v1, %v119_v7  ;;  %v128_v9 = vadd.f32 %v126_v5, %v106_v48 }
 0x1ad   :  { %v127_v10 = vmul.f32 %v125_v8, %v581_v25  ;;  %v134_v11 = vmul.f32 %v133_v6, %v128_v9 }
 0x1af   :  { %v136_v12 = vsel %vm91_vm4, %v134_v11, 0.0  ;;  %v129_v13 = vadd.f32 %v127_v10, %v107_v52 }
 0x1b0   :  { %137 = vadd.xlane.f32.xlu1 %v136_v12 }
 0x1b1   :  { %v135_v14 = vmul.f32 %v133_v6, %v129_v13 }
 0x1b3   :  { %v139_v15 = vsel %vm91_vm4, %v135_v14, 0.0 }
 0x1b4   :  { %140 = vadd.xlane.f32.xlu1 %v139_v15 }
 0x214   :  { %v320_v17 = vpop.f32.mrf.mxu1 }
 0x215   :  { %v321_v18 = vadd.f32 %v391_v16, %v320_v17 }
 0x216   :  { %v450_v19 = vpop.f32.mrf.mxu1 }
 0x217   :  { %v327_v21 = vmax.f32 %v321_v18, 0.0 }
 0x218   :  { %v323_v22 = vpop.f32.mrf.mxu1 }
 0x219   :  { %v351_v23 = vmul.f32 %v401_v20, %v327_v21  ;;  %v324_v35 = vadd.f32 %v391_v16, %v323_v22 }
 0x21a   :  { %v451_v26 = vpop.f32.mrf.mxu1 }
 0x21b   :  { %v354_v27 = vsel %vm353_vm5, %v351_v23, 0.0  ;;  %v328_v41 = vmax.f32 %v324_v35, 0.0 }
 0x21c   :  { %355 = vadd.xlane.f32.xlu1 %v354_v27 }
 0x239   :  { %v138_v30 = vpop.xlane.xlu1 %137 }
 0x23a   :  { %v146_v31 = vadd.f32 %v145_v29, %v138_v30 }
 0x23c   :  { %v148_v32 = vmul.f32 %v146_v31, %v579_v24  ;;  %v352_v24 = vmul.f32 %v401_v20, %v328_v41 }
 0x23d   :  { %v141_v33 = vpop.xlane.xlu1 %140 }
 0x23e   :  { %v147_v36 = vadd.f32 %v145_v29, %v141_v33  ;;  %v150_v37 = vadd.f32 %v148_v32, %v128_v9  ;;  %v357_v45 = vsel %vm353_vm5, %v352_v24, 0.0 }
 0x240   :  { %v149_v38 = vmul.f32 %v147_v36, %v581_v25  ;;  %v336_v40 = vmul.f32 %v400_v34, %v150_v37 }
 0x242   :  { %v338_v42 = vsel %vm91_vm4, %v336_v40, 0.0  ;;  %v151_v43 = vadd.f32 %v149_v38, %v129_v13 }
 0x243   :  { %339 = vadd.xlane.f32.xlu1 %v338_v42 }
 0x244   :  { %v337_v39 = vmul.f32 %v400_v34, %v151_v43 }
 0x246   :  { %v341_v44 = vsel %vm91_vm4, %v337_v39, 0.0 }
 0x247   :  { %342 = vadd.xlane.f32.xlu1 %v341_v44 }
 0x24b   :  { %358 = vadd.xlane.f32.xlu1 %v357_v45 }
 0x2a5   :  { %v356_v46 = vpop.xlane.xlu1 %355 }
 0x2cc   :  { %v340_v48 = vpop.xlane.xlu1 %339 }
 0x2cd   :  { %v360_v49 = vadd.f32 %v356_v46, %v340_v48 }
 0x2cf   :  { %v369_v50 = vadd.f32 %v402_v47, %v360_v49 }
 0x2d0   :  { %v343_v25 = vpop.xlane.xlu1 %342 }
 0x2d1   :  { %v371_v51 = vsub.f32 0.0, %v369_v50 }
 0x2d3   :  { %v373_v52 = vmul.f32 1.442695, %v371_v51 }
 0x2d4   :  { %v359_v53 = vpop.xlane.xlu1 %358 }
 0x2d5   :  { %475 = vpow2.f32 %v373_v52  ;;  %v361_v54 = vadd.f32 %v359_v53, %v343_v25 }
 0x2d7   :  { %v370_v55 = vadd.f32 %v402_v47, %v361_v54 }
 0x2d9   :  { %v372_v56 = vsub.f32 0.0, %v370_v55 }
 0x2db   :  { %v375_v57 = vmul.f32 1.442695, %v372_v56 }
 0x2dd   :  { %477 = vpow2.f32 %v375_v57 }
 0x2e2   :  { %v476_v58 = vpop.eup %475 }
 0x2e3   :  { %v377_v59 = vadd.f32 1.0, %v476_v58 }
 0x2e5   :  { %479 = vrcp.f32 %v377_v59 }
 0x2ea   :  { %v478_v60 = vpop.eup %477 }
 0x2eb   :  { %v378_v61 = vadd.f32 1.0, %v478_v60 }
 0x2ed   :  { %481 = vrcp.f32 %v378_v61 }
 0x2f2   :  { %v480_v62 = vpop.eup %479 }
 0x2f3   :  { %382 = vst.msk [vmem:[%s682_s12] sm:$0xff] %vm381_vm6, %v480_v62 }
 0x2fa   :  { %v482_v63 = vpop.eup %481 }
 0x2fb   :  { %383 = vst.msk [vmem:[%s682_s12 + $0x8] sm:$0xff] %vm381_vm6, %v482_v63 }

</bundles_post_ra>
